<compile_context>
chip_gen: v6e
topology: v6e:2x2x1
jax: 0.10.0
libtpu: 0.0.40
codegen_flags: <defaults>
</compile_context>

<pallas_src>
import functools

import jax
import jax.numpy as jnp
import numpy as np
from jax.experimental import pallas as pl
from jax.experimental.pallas import tpu as pltpu

LANE = 128


# ---------------------------------------------------------------------------
# Host-side packing helpers (run once).
# ---------------------------------------------------------------------------
def _pack(mats, lane=LANE, align=8):
    """Row-stack 2-D f32 matrices into one (R, lane) slab.

    Each matrix is zero-padded to `lane` columns and its row count rounded up to a
    multiple of `align`, so every live sub-block starts at a sublane-aligned offset
    with lane offset 0.  Returns (slab, [(row_offset, rows, cols), ...]).
    """
    pieces, meta, off = [], [], 0
    for m in mats:
        m = jnp.asarray(m, jnp.float32)
        r, c = m.shape
        assert c <= lane, f"matrix width {c} exceeds lane width {lane}"
        rpad = (-r) % align
        pieces.append(jnp.pad(m, ((0, rpad), (0, lane - c))))
        meta.append((off, r, c))
        off += r + rpad
    return jnp.concatenate(pieces, axis=0), meta


def _pad_rows(w, rows):
    w = jnp.asarray(w, jnp.float32)
    assert w.shape[0] <= rows
    return jnp.pad(w, ((0, rows - w.shape[0]), (0, 0)))


# ---------------------------------------------------------------------------
# Fused forward kernel: 2 packed VMEM operands -> 1 lane-dense VMEM output slab.
# ---------------------------------------------------------------------------
def _fused_forward_kernel(cfg, gpack_ref, ppack_ref, out_ref):
    G, T = cfg["G"], cfg["T"]
    gm, pm = cfg["gmeta"], cfg["pmeta"]

    def load(ref, meta, full_lanes=False):
        off, r, c = meta
        return ref[off:off + r, :] if full_lanes else ref[off:off + r, 0:c]

    # --- embedding gather fused into the kernel as exact one-hot matmuls ---
    xp = jnp.dot(load(gpack_ref, gm["sel_p"]), load(ppack_ref, pm["emb_p"]),
                 preferred_element_type=jnp.float32)             # (P, Fp)
    xt = jnp.dot(load(gpack_ref, gm["sel_t"]), load(ppack_ref, pm["emb_t"]),
                 preferred_element_type=jnp.float32)             # (T, Ft)

    a_tp = load(gpack_ref, gm["a_tp"])                           # (T, P) mean-normalized
    a_pt = load(gpack_ref, gm["a_pt"])                           # (P, T)

    # --- SAGE layers: mean aggregation (dense adjacency matmul) + two dots summed
    #     per node type (no lane-axis concat, no bf16 casts -> pure f32) ---
    for li in range(cfg["num_layers"]):
        wl_t = load(ppack_ref, pm[f"wl_t{li}"], full_lanes=True)
        wr_t = load(ppack_ref, pm[f"wr_t{li}"], full_lanes=True)
        b_t = load(ppack_ref, pm[f"b_t{li}"], full_lanes=True)
        wl_p = load(ppack_ref, pm[f"wl_p{li}"], full_lanes=True)
        wr_p = load(ppack_ref, pm[f"wr_p{li}"], full_lanes=True)
        b_p = load(ppack_ref, pm[f"b_p{li}"], full_lanes=True)

        agg_t = jnp.dot(a_tp, xp, preferred_element_type=jnp.float32)   # (T, Fp|128)
        agg_p = jnp.dot(a_pt, xt, preferred_element_type=jnp.float32)   # (P, Ft|128)

        xt_new = jnp.maximum(
            jnp.dot(agg_t, wl_t, preferred_element_type=jnp.float32)
            + jnp.dot(xt, wr_t, preferred_element_type=jnp.float32) + b_t, 0.0)
        xp_new = jnp.maximum(
            jnp.dot(agg_p, wl_p, preferred_element_type=jnp.float32)
            + jnp.dot(xp, wr_p, preferred_element_type=jnp.float32) + b_p, 0.0)
        xt, xp = xt_new, xp_new
        # F.dropout(p=0.1, training=self.training): inference -> identity.

    # --- global "concat" pool over team nodes: concat([mean_pool, max_pool]) ---
    bmean = load(gpack_ref, gm["bmean"])                         # (G, T)
    bmask_t = load(gpack_ref, gm["bmask_t"])                     # (T, G) 0/1 membership
    mean_pool = jnp.dot(bmean, xt, preferred_element_type=jnp.float32)   # (G, 128)

    rows = []
    for gi in range(G):          # G tiny & static -> unrolled, 2-D only
        member = bmask_t[:, gi:gi + 1]                           # (T, 1) in {0, 1}
        # xt >= 0 after ReLU, so masking with 0 gives the per-graph max
        # (and 0 for empty graphs -- no -inf bias / guard needed).
        rows.append(jnp.max(xt * member, axis=0, keepdims=True))
    max_pool = jnp.concatenate(rows, axis=0)                     # (G, 128)

    # --- head: split weight (no pooled concat); bias lanes >= C are -1e30 so padded
    #     logit lanes vanish under softmax; exact divide (tiny at (G, C)) ---
    logits = (jnp.dot(mean_pool, load(ppack_ref, pm["w_mean"], full_lanes=True),
                      preferred_element_type=jnp.float32)
              + jnp.dot(max_pool, load(ppack_ref, pm["w_max"], full_lanes=True),
                        preferred_element_type=jnp.float32)
              + load(ppack_ref, pm["b_head"], full_lanes=True))  # (G, 128)

    m = jnp.max(logits, axis=-1, keepdims=True)
    e = jnp.exp(logits - m)
    y = e / jnp.sum(e, axis=-1, keepdims=True)

    # lane-dense output slab: rows [0, G) = softmax probs, rows [G, G+T) = team features
    out_ref[0:G, :] = y
    out_ref[G:G + T, :] = xt


def build_model5_forward(gmeta, pmeta, num_layers, P, T, G, H, C):
    cfg = dict(gmeta=gmeta, pmeta=pmeta, num_layers=num_layers, P=P, T=T, G=G)
    kernel = functools.partial(_fused_forward_kernel, cfg)
    vmem = pl.BlockSpec(memory_space=pltpu.MemorySpace.VMEM)

    @jax.jit
    def forward(gpack, ppack):
        out = pl.pallas_call(
            kernel,
            out_shape=jax.ShapeDtypeStruct((G + T, LANE), jnp.float32),
            in_specs=[vmem, vmem],
            out_specs=vmem,
        )(gpack, ppack)
        return out[:G, :C], out[G:G + T, :H]

    return forward


# ---------------------------------------------------------------------------
# Graph-static preprocessing (run once, outside the forward loop).
# ---------------------------------------------------------------------------
def build_mean_adj(dst_idx, src_idx, num_dst, num_src):
    a = jnp.zeros((num_dst, num_src), jnp.float32)
    a = a.at[dst_idx, src_idx].add(1.0)
    deg = jnp.sum(a, axis=1, keepdims=True)
    return a / jnp.maximum(deg, 1.0)         # zero-degree rows stay zero


def prepare_graph_pack(edge_index_plays, batch, player_ids, team_ids,
                       num_players, num_teams, num_graphs):
    P, T = player_ids.shape[0], team_ids.shape[0]
    sel_p = jax.nn.one_hot(player_ids, num_players, dtype=jnp.float32)   # (P, NP)
    sel_t = jax.nn.one_hot(team_ids, num_teams, dtype=jnp.float32)       # (T, NT)
    src_p, dst_t = edge_index_plays[0], edge_index_plays[1]
    a_tp = build_mean_adj(dst_t, src_p, T, P)    # ('players','plays','team')
    a_pt = build_mean_adj(src_p, dst_t, P, T)    # ('team','rev_plays','players')
    bmask = (batch[None, :] == jnp.arange(num_graphs)[:, None]).astype(jnp.float32)  # (G, T)
    bmean = bmask / jnp.maximum(jnp.sum(bmask, axis=1, keepdims=True), 1.0)
    mats = dict(sel_p=sel_p, sel_t=sel_t, a_tp=a_tp, a_pt=a_pt,
                bmean=bmean, bmask_t=bmask.T)
    slab, metas = _pack(list(mats.values()))
    gmeta = dict(zip(mats.keys(), metas))
    raw = dict(mats, bmask=bmask)
    return slab, gmeta, raw


# ---------------------------------------------------------------------------
# Parameters (f32 everywhere; bf16 dropped per review) + packing.
# ---------------------------------------------------------------------------
def init_params(key, num_players, num_teams, emb_players, emb_teams,
                hidden_channels, out_channels):
    keys = iter(jax.random.split(key, 8 + 6 * len(hidden_channels)))
    params = {}
    params["player_emb"] = jax.random.normal(next(keys), (num_players, emb_players), jnp.float32)
    params["team_emb"] = jax.random.normal(next(keys), (num_teams, emb_teams), jnp.float32)

    layers = []
    fp, ft = emb_players, emb_teams
    for h in hidden_channels:
        # team dst:  lin_l (src=players) fp->h (bias), lin_r (dst=team) ft->h (no bias)
        wl_t = jax.random.normal(next(keys), (fp, h), jnp.float32) * 0.1
        bl_t = jax.random.normal(next(keys), (1, h), jnp.float32) * 0.1
        wr_t = jax.random.normal(next(keys), (ft, h), jnp.float32) * 0.1
        # players dst: lin_l (src=team) ft->h (bias), lin_r (dst=players) fp->h (no bias)
        wl_p = jax.random.normal(next(keys), (ft, h), jnp.float32) * 0.1
        bl_p = jax.random.normal(next(keys), (1, h), jnp.float32) * 0.1
        wr_p = jax.random.normal(next(keys), (fp, h), jnp.float32) * 0.1
        layers.append((wl_t, bl_t, wr_t, wl_p, bl_p, wr_p))
        fp = ft = h
    params["layers"] = layers

    h_last = hidden_channels[-1]
    params["w_lin"] = jax.random.normal(next(keys), (2 * h_last, out_channels), jnp.float32) * 0.1
    params["b_lin"] = jax.random.normal(next(keys), (1, out_channels), jnp.float32) * 0.1
    return params


def prepare_params_pack(params):
    """Pack embeddings + all layer weights + split head into ONE (R, 128) f32 slab."""
    H = params["layers"][-1][0].shape[1]
    C = params["w_lin"].shape[1]
    assert H <= LANE and C <= LANE, "TODO(synk): block weights for H or C > 128"

    mats, names = [], []

    def add(name, m):
        names.append(name)
        mats.append(m)

    add("emb_p", params["player_emb"])
    add("emb_t", params["team_emb"])
    for li, (wl_t, bl_t, wr_t, wl_p, bl_p, wr_p) in enumerate(params["layers"]):
        if li > 0:
            # later layers consume 128-lane-padded activations -> zero-pad K to 128
            wl_t, wr_t = _pad_rows(wl_t, LANE), _pad_rows(wr_t, LANE)
            wl_p, wr_p = _pad_rows(wl_p, LANE), _pad_rows(wr_p, LANE)
        add(f"wl_t{li}", wl_t); add(f"wr_t{li}", wr_t); add(f"b_t{li}", bl_t)
        add(f"wl_p{li}", wl_p); add(f"wr_p{li}", wr_p); add(f"b_p{li}", bl_p)

    add("w_mean", _pad_rows(params["w_lin"][:H], LANE))
    add("w_max", _pad_rows(params["w_lin"][H:2 * H], LANE))
    b_head = jnp.concatenate(
        [params["b_lin"].astype(jnp.float32),
         jnp.full((1, LANE - C), -1e30, jnp.float32)], axis=1)   # mask padded softmax lanes
    add("b_head", b_head)

    slab, metas = _pack(mats)
    return slab, dict(zip(names, metas)), H, C


# ---------------------------------------------------------------------------
# Pure numpy (float64) reference for validation.
# ---------------------------------------------------------------------------
def reference_forward_np(params, raw):
    g = lambda x: np.asarray(jax.device_get(x), np.float64)
    xp = g(raw["sel_p"]) @ g(params["player_emb"])
    xt = g(raw["sel_t"]) @ g(params["team_emb"])
    for (wl_t, bl_t, wr_t, wl_p, bl_p, wr_p) in params["layers"]:
        agg_t = g(raw["a_tp"]) @ xp
        agg_p = g(raw["a_pt"]) @ xt
        xt_new = np.maximum(agg_t @ g(wl_t) + xt @ g(wr_t) + g(bl_t), 0.0)
        xp_new = np.maximum(agg_p @ g(wl_p) + xp @ g(wr_p) + g(bl_p), 0.0)
        xt, xp = xt_new, xp_new
    mean_pool = g(raw["bmean"]) @ xt
    bmask = g(raw["bmask"])
    max_pool = np.stack([np.max(xt * bmask[gi][:, None], axis=0)
                         for gi in range(bmask.shape[0])])
    pooled = np.concatenate([mean_pool, max_pool], axis=-1)
    logits = pooled @ g(params["w_lin"]) + g(params["b_lin"])
    e = np.exp(logits - logits.max(axis=-1, keepdims=True))
    return e / e.sum(axis=-1, keepdims=True), xt


if __name__ == "__main__":
    num_players, num_teams = 12, 6
    emb_players, emb_teams = 16, 8
    hidden_channels = [32, 32]
    out_channels = 4
    num_graphs = 2

    key = jax.random.PRNGKey(0)
    params = init_params(key, num_players, num_teams, emb_players, emb_teams,
                         hidden_channels, out_channels)

    # deterministic toy graph: every player plays for team (i % T); first 4 players
    # additionally play for team ((i+1) % T) so the mean aggregation is nontrivial.
    src = jnp.concatenate([jnp.arange(num_players), jnp.arange(4)])
    dst = jnp.concatenate([jnp.arange(num_players) % num_teams,
                           (jnp.arange(4) + 1) % num_teams])
    edge_index_plays = jnp.stack([src, dst]).astype(jnp.int32)   # (2, 16)

    player_ids = jnp.arange(num_players, dtype=jnp.int32)
    team_ids = jnp.arange(num_teams, dtype=jnp.int32)
    batch = jnp.array([0, 0, 0, 1, 1, 1], dtype=jnp.int32)       # team node -> graph id

    # one-time packing: 2 VMEM operands total (graph slab + params slab)
    gpack, gmeta, raw = prepare_graph_pack(edge_index_plays, batch, player_ids, team_ids,
                                           num_players, num_teams, num_graphs)
    ppack, pmeta, H, C = prepare_params_pack(params)

    P, T, G = int(player_ids.shape[0]), int(team_ids.shape[0]), num_graphs
    forward = build_model5_forward(gmeta, pmeta, len(hidden_channels), P, T, G, H, C)

    y, team_feats = forward(gpack, ppack)
    jax.block_until_ready((y, team_feats))

    y_ref, team_ref = reference_forward_np(params, raw)

    assert y.shape == (num_graphs, out_channels)
    assert team_feats.shape == (num_teams, hidden_channels[-1])
    assert bool(jnp.all(jnp.isfinite(y))) and bool(jnp.all(jnp.isfinite(team_feats)))
    assert bool(jnp.allclose(jnp.sum(y, axis=-1), 1.0, atol=1e-4))
    assert np.allclose(np.asarray(y, np.float64), y_ref, atol=2e-2)
    assert np.allclose(np.asarray(team_feats, np.float64), team_ref, atol=2e-2)
    print("KERNEL_OK")
</pallas_src>

<mosaic_0001>
module attributes {stable_mosaic.version = 11 : i64} {
  func.func @_fused_forward_kernel(%arg0: memref<64x128xf32, #tpu.memory_space<vmem>>, %arg1: memref<880x128xf32, #tpu.memory_space<vmem>>, %arg2: memref<8x128xf32, #tpu.memory_space<vmem>>) attributes {dimension_semantics = [], scalar_prefetch = 0 : i64, scratch_operands = 0 : i64, tpu.core_type = #tpu.core_type<tc>} {
    %c0 = arith.constant 0 : index
    %c0_0 = arith.constant 0 : index
    %0 = vector.load %arg0[%c0, %c0_0] : memref<64x128xf32, #tpu.memory_space<vmem>>, vector<12x12xf32>
    %c0_1 = arith.constant 0 : index
    %c0_2 = arith.constant 0 : index
    %1 = vector.load %arg1[%c0_1, %c0_2] : memref<880x128xf32, #tpu.memory_space<vmem>>, vector<12x16xf32>
    %cst = arith.constant dense<0.000000e+00> : vector<12x16xf32>
    %2 = tpu.matmul %0, %1, %cst {dimension_numbers = #tpu.dot_dimension_numbers<[1], [0], [0], [1], [0, 0, 1, 1], [], []>} : vector<12x12xf32>, vector<12x16xf32>, vector<12x16xf32> -> vector<12x16xf32>
    %c16 = arith.constant 16 : index
    %c0_3 = arith.constant 0 : index
    %3 = vector.load %arg0[%c16, %c0_3] : memref<64x128xf32, #tpu.memory_space<vmem>>, vector<6x6xf32>
    %c16_4 = arith.constant 16 : index
    %c0_5 = arith.constant 0 : index
    %4 = vector.load %arg1[%c16_4, %c0_5] : memref<880x128xf32, #tpu.memory_space<vmem>>, vector<6x8xf32>
    %cst_6 = arith.constant dense<0.000000e+00> : vector<6x8xf32>
    %5 = tpu.matmul %3, %4, %cst_6 {dimension_numbers = #tpu.dot_dimension_numbers<[1], [0], [0], [1], [0, 0, 1, 1], [], []>} : vector<6x6xf32>, vector<6x8xf32>, vector<6x8xf32> -> vector<6x8xf32>
    %c24 = arith.constant 24 : index
    %c0_7 = arith.constant 0 : index
    %6 = vector.load %arg0[%c24, %c0_7] : memref<64x128xf32, #tpu.memory_space<vmem>>, vector<6x12xf32>
    %c32 = arith.constant 32 : index
    %c0_8 = arith.constant 0 : index
    %7 = vector.load %arg0[%c32, %c0_8] : memref<64x128xf32, #tpu.memory_space<vmem>>, vector<12x6xf32>
    %c24_9 = arith.constant 24 : index
    %c0_10 = arith.constant 0 : index
    %8 = vector.load %arg1[%c24_9, %c0_10] : memref<880x128xf32, #tpu.memory_space<vmem>>, vector<16x128xf32>
    %c40 = arith.constant 40 : index
    %c0_11 = arith.constant 0 : index
    %9 = vector.load %arg1[%c40, %c0_11] : memref<880x128xf32, #tpu.memory_space<vmem>>, vector<8x128xf32>
    %c48 = arith.constant 48 : index
    %c0_12 = arith.constant 0 : index
    %10 = vector.load %arg1[%c48, %c0_12] : memref<880x128xf32, #tpu.memory_space<vmem>>, vector<1x128xf32>
    %c56 = arith.constant 56 : index
    %c0_13 = arith.constant 0 : index
    %11 = vector.load %arg1[%c56, %c0_13] : memref<880x128xf32, #tpu.memory_space<vmem>>, vector<8x128xf32>
    %c64 = arith.constant 64 : index
    %c0_14 = arith.constant 0 : index
    %12 = vector.load %arg1[%c64, %c0_14] : memref<880x128xf32, #tpu.memory_space<vmem>>, vector<16x128xf32>
    %c80 = arith.constant 80 : index
    %c0_15 = arith.constant 0 : index
    %13 = vector.load %arg1[%c80, %c0_15] : memref<880x128xf32, #tpu.memory_space<vmem>>, vector<1x128xf32>
    %cst_16 = arith.constant dense<0.000000e+00> : vector<6x16xf32>
    %14 = tpu.matmul %6, %2, %cst_16 {dimension_numbers = #tpu.dot_dimension_numbers<[1], [0], [0], [1], [0, 0, 1, 1], [], []>} : vector<6x12xf32>, vector<12x16xf32>, vector<6x16xf32> -> vector<6x16xf32>
    %cst_17 = arith.constant dense<0.000000e+00> : vector<12x8xf32>
    %15 = tpu.matmul %7, %5, %cst_17 {dimension_numbers = #tpu.dot_dimension_numbers<[1], [0], [0], [1], [0, 0, 1, 1], [], []>} : vector<12x6xf32>, vector<6x8xf32>, vector<12x8xf32> -> vector<12x8xf32>
    %cst_18 = arith.constant dense<0.000000e+00> : vector<6x128xf32>
    %16 = tpu.matmul %14, %8, %cst_18 {dimension_numbers = #tpu.dot_dimension_numbers<[1], [0], [0], [1], [0, 0, 1, 1], [], []>} : vector<6x16xf32>, vector<16x128xf32>, vector<6x128xf32> -> vector<6x128xf32>
    %cst_19 = arith.constant dense<0.000000e+00> : vector<6x128xf32>
    %17 = tpu.matmul %5, %9, %cst_19 {dimension_numbers = #tpu.dot_dimension_numbers<[1], [0], [0], [1], [0, 0, 1, 1], [], []>} : vector<6x8xf32>, vector<8x128xf32>, vector<6x128xf32> -> vector<6x128xf32>
    %18 = arith.addf %16, %17 : vector<6x128xf32>
    %19 = vector.broadcast %10 : vector<1x128xf32> to vector<6x128xf32>
    %20 = arith.addf %18, %19 : vector<6x128xf32>
    %cst_20 = arith.constant 0.000000e+00 : f32
    %21 = vector.broadcast %cst_20 : f32 to vector<6x128xf32>
    %22 = arith.maximumf %20, %21 : vector<6x128xf32>
    %cst_21 = arith.constant dense<0.000000e+00> : vector<12x128xf32>
    %23 = tpu.matmul %15, %11, %cst_21 {dimension_numbers = #tpu.dot_dimension_numbers<[1], [0], [0], [1], [0, 0, 1, 1], [], []>} : vector<12x8xf32>, vector<8x128xf32>, vector<12x128xf32> -> vector<12x128xf32>
    %cst_22 = arith.constant dense<0.000000e+00> : vector<12x128xf32>
    %24 = tpu.matmul %2, %12, %cst_22 {dimension_numbers = #tpu.dot_dimension_numbers<[1], [0], [0], [1], [0, 0, 1, 1], [], []>} : vector<12x16xf32>, vector<16x128xf32>, vector<12x128xf32> -> vector<12x128xf32>
    %25 = arith.addf %23, %24 : vector<12x128xf32>
    %26 = vector.broadcast %13 : vector<1x128xf32> to vector<12x128xf32>
    %27 = arith.addf %25, %26 : vector<12x128xf32>
    %cst_23 = arith.constant 0.000000e+00 : f32
    %28 = vector.broadcast %cst_23 : f32 to vector<12x128xf32>
    %29 = arith.maximumf %27, %28 : vector<12x128xf32>
    %c88 = arith.constant 88 : index
    %c0_24 = arith.constant 0 : index
    %30 = vector.load %arg1[%c88, %c0_24] : memref<880x128xf32, #tpu.memory_space<vmem>>, vector<128x128xf32>
    %c216 = arith.constant 216 : index
    %c0_25 = arith.constant 0 : index
    %31 = vector.load %arg1[%c216, %c0_25] : memref<880x128xf32, #tpu.memory_space<vmem>>, vector<128x128xf32>
    %c344 = arith.constant 344 : index
    %c0_26 = arith.constant 0 : index
    %32 = vector.load %arg1[%c344, %c0_26] : memref<880x128xf32, #tpu.memory_space<vmem>>, vector<1x128xf32>
    %cst_27 = arith.constant dense<0.000000e+00> : vector<6x128xf32>
    %33 = tpu.matmul %6, %29, %cst_27 {dimension_numbers = #tpu.dot_dimension_numbers<[1], [0], [0], [1], [0, 0, 1, 1], [], []>} : vector<6x12xf32>, vector<12x128xf32>, vector<6x128xf32> -> vector<6x128xf32>
    %cst_28 = arith.constant dense<0.000000e+00> : vector<6x128xf32>
    %34 = tpu.matmul %33, %30, %cst_28 {dimension_numbers = #tpu.dot_dimension_numbers<[1], [0], [0], [1], [0, 0, 1, 1], [], []>} : vector<6x128xf32>, vector<128x128xf32>, vector<6x128xf32> -> vector<6x128xf32>
    %cst_29 = arith.constant dense<0.000000e+00> : vector<6x128xf32>
    %35 = tpu.matmul %22, %31, %cst_29 {dimension_numbers = #tpu.dot_dimension_numbers<[1], [0], [0], [1], [0, 0, 1, 1], [], []>} : vector<6x128xf32>, vector<128x128xf32>, vector<6x128xf32> -> vector<6x128xf32>
    %36 = arith.addf %34, %35 : vector<6x128xf32>
    %37 = vector.broadcast %32 : vector<1x128xf32> to vector<6x128xf32>
    %38 = arith.addf %36, %37 : vector<6x128xf32>
    %cst_30 = arith.constant 0.000000e+00 : f32
    %39 = vector.broadcast %cst_30 : f32 to vector<6x128xf32>
    %40 = arith.maximumf %38, %39 : vector<6x128xf32>
    %c48_31 = arith.constant 48 : index
    %c0_32 = arith.constant 0 : index
    %41 = vector.load %arg0[%c48_31, %c0_32] : memref<64x128xf32, #tpu.memory_space<vmem>>, vector<2x6xf32>
    %c56_33 = arith.constant 56 : index
    %c0_34 = arith.constant 0 : index
    %42 = vector.load %arg0[%c56_33, %c0_34] : memref<64x128xf32, #tpu.memory_space<vmem>>, vector<6x2xf32>
    %cst_35 = arith.constant dense<0.000000e+00> : vector<2x128xf32>
    %43 = tpu.matmul %41, %40, %cst_35 {dimension_numbers = #tpu.dot_dimension_numbers<[1], [0], [0], [1], [0, 0, 1, 1], [], []>} : vector<2x6xf32>, vector<6x128xf32>, vector<2x128xf32> -> vector<2x128xf32>
    %44 = vector.extract_strided_slice %42 {offsets = [0, 0], sizes = [6, 1], strides = [1, 1]} : vector<6x2xf32> to vector<6x1xf32>
    %45 = vector.broadcast %44 : vector<6x1xf32> to vector<6x128xf32>
    %46 = arith.mulf %40, %45 : vector<6x128xf32>
    %cst_36 = arith.constant dense<0xFF800000> : vector<128xf32>
    %47 = vector.multi_reduction <maximumf>, %46, %cst_36 [0] : vector<6x128xf32> to vector<128xf32>
    %48 = vector.shape_cast %47 : vector<128xf32> to vector<1x128xf32>
    %49 = vector.extract_strided_slice %42 {offsets = [0, 1], sizes = [6, 1], strides = [1, 1]} : vector<6x2xf32> to vector<6x1xf32>
    %50 = vector.broadcast %49 : vector<6x1xf32> to vector<6x128xf32>
    %51 = arith.mulf %40, %50 : vector<6x128xf32>
    %cst_37 = arith.constant dense<0xFF800000> : vector<128xf32>
    %52 = vector.multi_reduction <maximumf>, %51, %cst_37 [0] : vector<6x128xf32> to vector<128xf32>
    %53 = vector.shape_cast %52 : vector<128xf32> to vector<1x128xf32>
    %54 = tpu.concatenate %48, %53 in 0 : vector<1x128xf32>, vector<1x128xf32> -> vector<2x128xf32>
    %c616 = arith.constant 616 : index
    %c0_38 = arith.constant 0 : index
    %55 = vector.load %arg1[%c616, %c0_38] : memref<880x128xf32, #tpu.memory_space<vmem>>, vector<128x128xf32>
    %cst_39 = arith.constant dense<0.000000e+00> : vector<2x128xf32>
    %56 = tpu.matmul %43, %55, %cst_39 {dimension_numbers = #tpu.dot_dimension_numbers<[1], [0], [0], [1], [0, 0, 1, 1], [], []>} : vector<2x128xf32>, vector<128x128xf32>, vector<2x128xf32> -> vector<2x128xf32>
    %c744 = arith.constant 744 : index
    %c0_40 = arith.constant 0 : index
    %57 = vector.load %arg1[%c744, %c0_40] : memref<880x128xf32, #tpu.memory_space<vmem>>, vector<128x128xf32>
    %cst_41 = arith.constant dense<0.000000e+00> : vector<2x128xf32>
    %58 = tpu.matmul %54, %57, %cst_41 {dimension_numbers = #tpu.dot_dimension_numbers<[1], [0], [0], [1], [0, 0, 1, 1], [], []>} : vector<2x128xf32>, vector<128x128xf32>, vector<2x128xf32> -> vector<2x128xf32>
    %59 = arith.addf %56, %58 : vector<2x128xf32>
    %c872 = arith.constant 872 : index
    %c0_42 = arith.constant 0 : index
    %60 = vector.load %arg1[%c872, %c0_42] : memref<880x128xf32, #tpu.memory_space<vmem>>, vector<1x128xf32>
    %61 = vector.broadcast %60 : vector<1x128xf32> to vector<2x128xf32>
    %62 = arith.addf %59, %61 : vector<2x128xf32>
    %cst_43 = arith.constant dense<0xFF800000> : vector<2xf32>
    %63 = vector.multi_reduction <maximumf>, %62, %cst_43 [1] : vector<2x128xf32> to vector<2xf32>
    %64 = vector.shape_cast %63 : vector<2xf32> to vector<2x1xf32>
    %65 = vector.broadcast %64 : vector<2x1xf32> to vector<2x128xf32>
    %66 = arith.subf %62, %65 : vector<2x128xf32>
    %67 = math.exp %66 : vector<2x128xf32>
    %cst_44 = arith.constant dense<0.000000e+00> : vector<2xf32>
    %68 = vector.multi_reduction <add>, %67, %cst_44 [1] : vector<2x128xf32> to vector<2xf32>
    %69 = vector.shape_cast %68 : vector<2xf32> to vector<2x1xf32>
    %70 = vector.broadcast %69 : vector<2x1xf32> to vector<2x128xf32>
    %71 = arith.divf %67, %70 : vector<2x128xf32>
    %c0_45 = arith.constant 0 : index
    %c0_46 = arith.constant 0 : index
    %72 = vector.load %arg2[%c0_45, %c0_46] : memref<8x128xf32, #tpu.memory_space<vmem>>, vector<2x128xf32>
    tpu.vector_store %arg2[%c0_45, %c0_46], %71 {strides = array<i32>} : memref<8x128xf32, #tpu.memory_space<vmem>>, vector<2x128xf32>,
    %c2 = arith.constant 2 : index
    %c0_47 = arith.constant 0 : index
    %73 = vector.load %arg2[%c2, %c0_47] : memref<8x128xf32, #tpu.memory_space<vmem>>, vector<6x128xf32>
    tpu.vector_store %arg2[%c2, %c0_47], %40 {strides = array<i32>} : memref<8x128xf32, #tpu.memory_space<vmem>>, vector<6x128xf32>,
    return
  }
}

</mosaic_0001>

<bundles_post_ra>
// kernel: forward.1
= control target key start
LH: loop header
LB: loop body
LE: loop exit
PB: predicated region body
PF: predicated region fallthrough
CT: control target
= control target key end

     0   :  { %7 = vsyncpa [#allocation3], 0  ;;  %s1792_s0 = inlined_call_operand.hbm [shape: f32[64,128], index: 0, kind: input, shape index: {}]   ;;  %s1793_s1 = inlined_call_operand.hbm [shape: f32[880,128], index: 1, kind: input, shape index: {}]   ;;  %s1794_s2 = inlined_call_operand.vmem [shape: f32[8,128], index: 2, kind: output, shape index: {}]  }
   0x1   :  { %8 = vsyncpa [#allocation5], 0  ;;  %s1636_s9 = smov [#allocation2]  }
   0x2   :  { %s14_s10 = sshll.u32 %s1636_s9, 4  ;;  %s15_s10 = int_to_ptr.vmem [resolvable:$true] %s14_s10 }
   0x3   :  { %s1600_s11 = scalar_lea.vmem %s15_s10, 1024  ;;  %p1605_p1 = scmp.lt.s32.totalorder %s15_s10, %s15_s10 }
   0x4   :  { %p1601_p0 = scmp.ne.s32.totalorder %s15_s10, %s1600_s11  ;;  %p1606_p2 = scmp.lt.s32.totalorder %s1600_s11, %s1600_s11 }
   0x6   :  { %p1607_p3 = por %p1606_p2, %p1605_p1 }
   0x8   :  { %p1608_p4 = pnand %p1607_p3, %p1601_p0 }
   0xa   :  { %1611 = shalt.err (!%p1608_p4)
}
   0xb   :  { %s1637_s12 = smov 128   ;;  %s1638_s13 = smov 8  }
   0xc   :  { %20 = dma.hbm_to_vmem [thread:$0]  %s1792_s0, 1024, %s15_s10, [#allocation3], %s1637_s12, %s1637_s12, %s1638_s13  }
   0xd   :  { %s1639_s16 = smov [#allocation4]  }
   0xe   :  { %s26_s17 = sshll.u32 %s1639_s16, 4  ;;  %s27_s17 = int_to_ptr.vmem [resolvable:$true] %s26_s17 }
   0xf   :  { %s1620_s18 = scalar_lea.vmem %s27_s17, 14080  ;;  %p1625_p6 = scmp.lt.s32.totalorder %s27_s17, %s27_s17 }
  0x10   :  { %p1621_p5 = scmp.ne.s32.totalorder %s27_s17, %s1620_s18  ;;  %p1626_p7 = scmp.lt.s32.totalorder %s1620_s18, %s1620_s18 }
  0x12   :  { %p1627_p8 = por %p1626_p7, %p1625_p6 }
  0x14   :  { %p1628_p9 = pnand %p1627_p8, %p1621_p5 }
  0x16   :  { %1631 = shalt.err (!%p1628_p9)
}
  0x17   :  { %32 = dma.hbm_to_vmem [thread:$0]  %s1793_s1, 14080, %s27_s17, [#allocation5], %s1637_s12, %s1637_s12, %s1638_s13  }
  0x18   :  { %1632 = dma.done.wait [#allocation3], 1024  }
  0x19   :  { %1633 = vsyncadd [#allocation3], 4294966272 }
  0x1a   :  { %1634 = dma.done.wait [#allocation5], 14080  }
  0x1b   :  { %1635 = vsyncadd [#allocation5], 4294953216  ;;  %v1640_v0 = vmov 0.0   ;;  %vm1641_vm0 = vmmov 0   ;;  %vm50_vm1 = vcmask 1043456   ;;  %vm43_vm2 = vcmask 97280  }
  0x1c   :  { %1385 = vmatprep.subr.mxu1 %v1640_v0  ;;  %1387 = vmatprep.mubr.msk.f32.mxu1 %vm1641_vm0, %v1640_v0  ;;  %vm135_vm3 = vcmask 1045504   ;;  %v42_v1 = vld [vmem:[#allocation4 + $0x8] sm:$0xf]  ;;  %v41_v2 = vld [vmem:[#allocation4] sm:$0xff]  ;;  %vm131_vm4 = vcmask 48128   ;;  %vm380_vm5 = vcmask 64512  }
  0x1d   :  { %v39_v3 = vld [vmem:[#allocation2] sm:$0xff]  ;;  %1378 = vmatprep.subr.msk.mxu0 %vm50_vm1, %v42_v1  ;;  %v130_v4 = vld [vmem:[#allocation4 + $0x10] sm:$0x3f]  ;;  %v40_v6 = vld [vmem:[#allocation2 + $0x8] sm:$0xf]  ;;  %vm453_vm6 = vcmask 130048  }
  0x1e   :  { %1382 = vmatprep.mubr.msk.f32.mxu0 %vm43_vm2, %v39_v3  ;;  %v129_v5 = vld [vmem:[#allocation2 + $0x10] sm:$0x3f]  ;;  %1379 = vmatpush3.msk.msra.mxu0 %vm50_vm1, %v42_v1  ;;  %v210_v7 = vld [vmem:[#allocation2 + $0x20] sm:$0xff]  ;;  %v211_v9 = vld [vmem:[#allocation2 + $0x28] sm:$0xf]  ;;  %vm1057_vm7 = vcmask 1040384  }
  0x1f   :  { %1386 = vmatpush3.msk.msra.mxu1 %vm135_vm3, %v130_v4  ;;  %1380 = vmatprep.subr.mxu0 %v41_v2  ;;  %v213_v12 = vld [vmem:[#allocation4 + $0x20] sm:$0xff]  ;;  %v1682_v13 = vld [vmem:[#allocation2 + $0x18] sm:$0x3f]  ;;  %v214_v15 = vld [vmem:[#allocation4 + $0x28] sm:$0xff]  ;;  %vm1237_vm8 = vcmask 1041408  }
  0x20   :  { %1388 = vmatmul.mubr.msk.f32.vlgmr.msra.gmra.mxu1 %vm131_vm4, %v129_v5  ;;  %1381 = vmatpush3.msra.mxu0 %v41_v2  ;;  %v218_v16 = vld [vmem:[#allocation4 + $0x48] sm:$0xff]  ;;  %v217_v17 = vld [vmem:[#allocation4 + $0x40] sm:$0xff]  ;;  %v212_v18 = vld [vmem:[#allocation4 + $0x18] sm:$0xff] }
  0x21   :  { %1390 = vmatprep.subr.mxu1 %v1640_v0  ;;  %1383 = vmatmul.mubr.msk.f32.vlgmr.msra.gmra.mxu0 %vm43_vm2, %v40_v6  ;;  %v216_v19 = vld [vmem:[#allocation4 + $0x38] sm:$0xff]  ;;  %v733_v24 = vld [vmem:[#allocation4 + $0x150] sm:$0xff]  ;;  %v732_v26 = vld [vmem:[#allocation4 + $0x148] sm:$0xff] }
  0x22   :  { %1394 = vmatprep.mubr.msk.f32.mxu1 %vm1641_vm0, %v1640_v0  ;;  %1399 = vmatprep.mubr.msk.f32.mxu0 %vm131_vm4, %v210_v7  ;;  %v731_v28 = vld [vmem:[#allocation4 + $0x140] sm:$0xff]  ;;  %v730_v29 = vld [vmem:[#allocation4 + $0x138] sm:$0xff]  ;;  %v729_v30 = vld [vmem:[#allocation4 + $0x130] sm:$0xff] }
  0x23   :  { %v728_v31 = vld [vmem:[#allocation4 + $0x128] sm:$0xff]  ;;  %v727_v32 = vld [vmem:[#allocation4 + $0x120] sm:$0xff]  ;;  %v726_v33 = vld [vmem:[#allocation4 + $0x118] sm:$0xff] }
  0x24   :  { %v725_v34 = vld [vmem:[#allocation4 + $0x110] sm:$0xff]  ;;  %v724_v35 = vld [vmem:[#allocation4 + $0x108] sm:$0xff]  ;;  %v723_v36 = vld [vmem:[#allocation4 + $0x100] sm:$0xff] }
  0x25   :  { %v722_v37 = vld [vmem:[#allocation4 + $0xf8] sm:$0xff]  ;;  %v721_v38 = vld [vmem:[#allocation4 + $0xf0] sm:$0xff]  ;;  %v720_v39 = vld [vmem:[#allocation4 + $0xe8] sm:$0xff] }
  0x26   :  { %v719_v40 = vld [vmem:[#allocation4 + $0xe0] sm:$0xff]  ;;  %v718_v41 = vld [vmem:[#allocation4 + $0xd8] sm:$0xff]  ;;  %v1269_v42 = vld [vmem:[#allocation4 + $0x30] ss:$0 sm:$0xff] }
  0x27   :  { %v1274_v48 = vld [vmem:[#allocation4 + $0x50] ss:$0 sm:$0xff]  ;;  %v716_v60 = vld [vmem:[#allocation4 + $0xc8] sm:$0xff]  ;;  %v715_v61 = vld [vmem:[#allocation4 + $0xc0] sm:$0xff] }
  0x28   :  { %v717_v59 = vld [vmem:[#allocation4 + $0xd0] sm:$0xff]  ;;  %v714_v62 = vld [vmem:[#allocation4 + $0xb8] sm:$0xff]  ;;  %v712_v1 = vld [vmem:[#allocation4 + $0xa8] sm:$0xff] }
  0x29   :  { %v713_v63 = vld [vmem:[#allocation4 + $0xb0] sm:$0xff]  ;;  %v711_v2 = vld [vmem:[#allocation4 + $0xa0] sm:$0xff]  ;;  %v710_v3 = vld [vmem:[#allocation4 + $0x98] sm:$0xff] }
  0x2a   :  { %v709_v4 = vld [vmem:[#allocation4 + $0x90] sm:$0xff]  ;;  %v708_v5 = vld [vmem:[#allocation4 + $0x88] sm:$0xff]  ;;  %v707_v6 = vld [vmem:[#allocation4 + $0x80] sm:$0xff] }
  0x2b   :  { %v706_v7 = vld [vmem:[#allocation4 + $0x78] sm:$0xff] }
  0xe0   :  { %v205_v8 = vpop.f32.mrf.mxu1 }
  0xe1   :  { %1397 = vmatprep.subr.msk.mxu0 %vm135_vm3, %v205_v8  ;;  %v1384_v10 = vpop.f32.mrf.mxu0 }
  0xe2   :  { %v1389_v11 = vpop.f32.mrf.mxu1  ;;  %1398 = vmatpush3.msk.msra.mxu0 %vm135_vm3, %v205_v8  ;;  %1391 = vmatpush3.msk.msra.mxu1 %vm50_vm1, %v1384_v10 }
  0xe3   :  { %1400 = vmatmul.mubr.msk.f32.vlgmr.msra.gmra.mxu0 %vm131_vm4, %v211_v9  ;;  %v120_v14 = vpop.f32.mrf.mxu0  ;;  %1392 = vmatprep.subr.mxu1 %v1640_v0  ;;  %v704_v9 = vld [vmem:[#allocation4 + $0x68] sm:$0xff]  ;;  %v702_v11 = vld [vmem:[#allocation4 + $0x58] sm:$0xff] }
  0xe4   :  { %1407 = vmatprep.subr.mxu0 %v1640_v0  ;;  %1393 = vmatpush3.msra.mxu1 %v120_v14 }
  0xe5   :  { %1408 = vmatpush3.msra.mxu0 %v213_v12  ;;  %1395 = vmatmul.mubr.msk.f32.vlgmr.msra.gmra.mxu1 %vm43_vm2, %v1682_v13  ;;  %v955_v12 = vld [vmem:[#allocation2 + $0x38] sm:$0x3f] }
  0xe6   :  { %1402 = vmatprep.subr.mxu1 %v1640_v0  ;;  %1404 = vmatprep.mubr.msk.f32.mxu1 %vm1641_vm0, %v1640_v0 }
  0xe7   :  { %1403 = vmatpush3.msra.mxu1 %v214_v15  ;;  %1409 = vmatprep.subr.mxu0 %v1640_v0 }
  0xe8   :  { %1414 = vmatprep.subr.mxu1 %v218_v16  ;;  %1411 = vmatprep.mubr.msk.f32.mxu0 %vm1641_vm0, %v1640_v0 }
  0xe9   :  { %1405 = vmatmul.mubr.msk.f32.vlgmr.msra.gmra.mxu1 %vm380_vm5, %v205_v8  ;;  %1410 = vmatpush3.msra.mxu0 %v212_v18  ;;  %v705_v8 = vld [vmem:[#allocation4 + $0x70] sm:$0xff] }
  0xea   :  { %1415 = vmatpush3.msra.mxu1 %v218_v16  ;;  %1418 = vmatprep.mubr.msk.f32.mxu1 %vm453_vm6, %v120_v14  ;;  %v1643_v14 = vmov 1  }
  0xeb   :  { %1416 = vmatprep.subr.mxu1 %v217_v17  ;;  %1421 = vmatprep.subr.mxu0 %v216_v19 }
  0xec   :  { %1417 = vmatpush3.msra.mxu1 %v217_v17  ;;  %v1090_v17 = vld [vmem:[#allocation4 + $0x360] sm:$0xff] }
  0xed   :  { %1419 = vmatmul.mubr.msk.f32.vlgmr.msra.gmra.mxu1 %vm453_vm6, %v1384_v10  ;;  %1426 = vmatprep.subr.mxu1 %v1640_v0  ;;  %v703_v10 = vld [vmem:[#allocation4 + $0x60] sm:$0xff] }
  0xee   :  { %1430 = vmatprep.mubr.msk.f32.mxu1 %vm1641_vm0, %v1640_v0 }
 0x1a3   :  { %v1401_v20 = vpop.f32.mrf.mxu0 }
 0x1a5   :  { %v371_v21 = vpop.f32.mrf.mxu0  ;;  %v292_v22 = vpop.f32.mrf.mxu1 }
 0x1a6   :  { %1412 = vmatmul.mubr.msk.f32.vlgmr.msra.gmra.mxu0 %vm453_vm6, %v292_v22  ;;  %v1087_v22 = vld [vmem:[#allocation4 + $0x348] sm:$0xff] }
 0x1a7   :  { %v1396_v23 = vpop.f32.mrf.mxu1  ;;  %1423 = vmatprep.mubr.msk.f32.mxu0 %vm380_vm5, %v371_v21  ;;  %1422 = vmatpush3.msra.mxu0 %v216_v19  ;;  %v1089_v19 = vld [vmem:[#allocation4 + $0x358] sm:$0xff]  ;;  %v1088_v21 = vld [vmem:[#allocation4 + $0x350] sm:$0xff] }
 0x1a8   :  { %1433 = vmatprep.subr.mxu0 %v1640_v0  ;;  %v1086_v23 = vld [vmem:[#allocation4 + $0x340] sm:$0xff] }
 0x1a9   :  { %v449_v25 = vpop.f32.mrf.mxu1 }
 0x1aa   :  { %1424 = vmatmul.mubr.msk.f32.vlgmr.msra.gmra.mxu0 %vm380_vm5, %v1401_v20 }
 0x1ab   :  { %v1406_v27 = vpop.f32.mrf.mxu1  ;;  %1434 = vmatpush3.msra.mxu0 %v733_v24  ;;  %1465 = vmatprep.mubr.msk.f32.mxu0 %vm1641_vm0, %v1640_v0  ;;  %v1085_v24 = vld [vmem:[#allocation4 + $0x338] sm:$0xff] }
 0x1ac   :  { %1435 = vmatprep.subr.mxu0 %v1640_v0  ;;  %v1082_v27 = vld [vmem:[#allocation4 + $0x320] sm:$0xff] }
 0x1ad   :  { %1436 = vmatpush3.msra.mxu0 %v732_v26  ;;  %v1420_v45 = vpop.f32.mrf.mxu1  ;;  %v1083_v26 = vld [vmem:[#allocation4 + $0x328] sm:$0xff] }
 0x1ae   :  { %1437 = vmatprep.subr.mxu0 %v1640_v0 }
 0x1af   :  { %1438 = vmatpush3.msra.mxu0 %v731_v28  ;;  %v604_v52 = vpop.f32.mrf.mxu1  ;;  %v1081_v28 = vld [vmem:[#allocation4 + $0x318] sm:$0xff] }
 0x1b0   :  { %1439 = vmatprep.subr.mxu0 %v1640_v0 }
 0x1b1   :  { %1440 = vmatpush3.msra.mxu0 %v730_v29  ;;  %v1080_v29 = vld [vmem:[#allocation4 + $0x310] sm:$0xff] }
 0x1b2   :  { %1441 = vmatprep.subr.mxu0 %v1640_v0 }
 0x1b3   :  { %1442 = vmatpush3.msra.mxu0 %v729_v30  ;;  %v1079_v30 = vld [vmem:[#allocation4 + $0x308] sm:$0xff] }
 0x1b4   :  { %1443 = vmatprep.subr.mxu0 %v1640_v0 }
 0x1b5   :  { %1444 = vmatpush3.msra.mxu0 %v728_v31  ;;  %v1078_v31 = vld [vmem:[#allocation4 + $0x300] sm:$0xff] }
 0x1b6   :  { %1445 = vmatprep.subr.mxu0 %v1640_v0 }
 0x1b7   :  { %1446 = vmatpush3.msra.mxu0 %v727_v32  ;;  %v1077_v32 = vld [vmem:[#allocation4 + $0x2f8] sm:$0xff] }
 0x1b8   :  { %1447 = vmatprep.subr.mxu0 %v1640_v0 }
 0x1b9   :  { %1448 = vmatpush3.msra.mxu0 %v726_v33  ;;  %v1076_v33 = vld [vmem:[#allocation4 + $0x2f0] sm:$0xff] }
 0x1ba   :  { %1449 = vmatprep.subr.mxu0 %v1640_v0 }
 0x1bb   :  { %1450 = vmatpush3.msra.mxu0 %v725_v34  ;;  %v1075_v34 = vld [vmem:[#allocation4 + $0x2e8] sm:$0xff] }
 0x1bc   :  { %1451 = vmatprep.subr.mxu0 %v1640_v0 }
 0x1bd   :  { %1452 = vmatpush3.msra.mxu0 %v724_v35 }
 0x1be   :  { %1453 = vmatprep.subr.mxu0 %v1640_v0 }
 0x1bf   :  { %1454 = vmatpush3.msra.mxu0 %v723_v36  ;;  %v1277_v36 = vld [vmem:[#allocation4 + $0x158] ss:$0 sm:$0xff] }
 0x1c0   :  { %1455 = vmatprep.subr.mxu0 %v1640_v0 }
 0x1c1   :  { %1456 = vmatpush3.msra.mxu0 %v722_v37 }
 0x1c2   :  { %1457 = vmatprep.subr.mxu0 %v1640_v0 }
 0x1c3   :  { %1458 = vmatpush3.msra.mxu0 %v721_v38 }
 0x1c4   :  { %1459 = vmatprep.subr.mxu0 %v1640_v0 }
 0x1c5   :  { %1460 = vmatpush3.msra.mxu0 %v720_v39 }
 0x1c6   :  { %1461 = vmatprep.subr.mxu0 %v1640_v0 }
 0x1c7   :  { %1462 = vmatpush3.msra.mxu0 %v719_v40 }
 0x1c8   :  { %1463 = vmatprep.subr.mxu0 %v1640_v0 }
 0x1c9   :  { %1464 = vmatpush3.msra.mxu0 %v718_v41 }
 0x1ca   :  { %1503 = vmatprep.subr.mxu0 %v1640_v0 }
 0x266   :  { %v523_v43 = vpop.f32.mrf.mxu0 }
 0x267   :  { %v524_v44 = vadd.f32 %v523_v43, %v449_v25  ;;  %v1084_v25 = vld [vmem:[#allocation4 + $0x330] sm:$0xff] }
 0x268   :  { %v1413_v46 = vpop.f32.mrf.mxu0  ;;  %v954_v43 = vld [vmem:[#allocation2 + $0x30] sm:$0x3] }
 0x269   :  { %v531_v47 = vadd.f32 %v1269_v42, %v524_v44  ;;  %v1074_v44 = vld [vmem:[#allocation4 + $0x2e0] sm:$0xff] }
 0x26a   :  { %v1425_v49 = vpop.f32.mrf.mxu0 }
 0x26b   :  { %v532_v50 = vmax.f32 %v531_v47, 0.0  ;;  %v691_v51 = vadd.f32 %v1425_v49, %v1420_v45  ;;  %v1073_v47 = vld [vmem:[#allocation4 + $0x2d8] sm:$0xff] }
 0x26c   :  { %v685_v53 = vpop.f32.mrf.mxu0 }
 0x26d   :  { %v699_v54 = vadd.f32 %v1274_v48, %v691_v51  ;;  %v686_v55 = vadd.f32 %v685_v53, %v604_v52  ;;  %1466 = vmatmul.mubr.f32.vlgmr.msra.gmra.mxu0 %v532_v50  ;;  %v1072_v52 = vld [vmem:[#allocation4 + $0x2d0] sm:$0xff] }
 0x26e   :  { %1505 = vmatprep.mubr.msk.f32.mxu0 %vm1641_vm0, %v1640_v0 }
 0x26f   :  { %v701_v56 = vmax.f32 %v699_v54, 0.0  ;;  %v698_v57 = vadd.f32 %v1274_v48, %v686_v55  ;;  %v1071_v55 = vld [vmem:[#allocation4 + $0x2c8] sm:$0xff] }
 0x271   :  { %v700_v58 = vmax.f32 %v698_v57, 0.0  ;;  %1427 = vmatpush3.msk.msra.mxu1 %vm50_vm1, %v701_v56 }
 0x272   :  { %1428 = vmatprep.subr.mxu1 %v1640_v0 }
 0x273   :  { %1429 = vmatpush3.msra.mxu1 %v700_v58  ;;  %v1070_v58 = vld [vmem:[#allocation4 + $0x2c0] sm:$0xff] }
 0x274   :  { %1431 = vmatmul.mubr.msk.f32.vlgmr.msra.gmra.mxu1 %vm43_vm2, %v1682_v13  ;;  %1468 = vmatprep.subr.mxu1 %v1640_v0  ;;  %v1642_v13 = vmov 0  }
 0x275   :  { %1469 = vmatpush3.msra.mxu1 %v717_v59  ;;  %1500 = vmatprep.mubr.msk.f32.mxu1 %vm1641_vm0, %v1640_v0 }
 0x276   :  { %1470 = vmatprep.subr.mxu1 %v1640_v0  ;;  %1586 = vset.pattern.permute.xlu0 %v1642_v13  ;;  %v1059_v13 = vld [vmem:[#allocation4 + $0x268] sm:$0xff] }
 0x277   :  { %1471 = vmatpush3.msra.mxu1 %v716_v60  ;;  %1034 = vperm.xlu0 %1586, %v955_v12  }
 0x278   :  { %1472 = vmatprep.subr.mxu1 %v1640_v0 }
 0x279   :  { %1473 = vmatpush3.msra.mxu1 %v715_v61  ;;  %v1069_v61 = vld [vmem:[#allocation4 + $0x2b8] sm:$0xff] }
 0x27a   :  { %1474 = vmatprep.subr.mxu1 %v1640_v0 }
 0x27b   :  { %1475 = vmatpush3.msra.mxu1 %v714_v62  ;;  %1587 = vset.pattern.permute.xlu0 %v1643_v14 }
 0x27c   :  { %1476 = vmatprep.subr.mxu1 %v1640_v0  ;;  %1046 = vperm.xlu0 %1587, %v955_v12   ;;  %v1060_v12 = vld [vmem:[#allocation4 + $0x270] sm:$0xff] }
 0x27d   :  { %1477 = vmatpush3.msra.mxu1 %v713_v63 }
 0x27e   :  { %1478 = vmatprep.subr.mxu1 %v1640_v0 }
 0x27f   :  { %1479 = vmatpush3.msra.mxu1 %v712_v1  ;;  %v1068_v1 = vld [vmem:[#allocation4 + $0x2b0] sm:$0xff] }
 0x280   :  { %1480 = vmatprep.subr.mxu1 %v1640_v0 }
 0x281   :  { %1481 = vmatpush3.msra.mxu1 %v711_v2 }
 0x282   :  { %1482 = vmatprep.subr.mxu1 %v1640_v0 }
 0x283   :  { %1483 = vmatpush3.msra.mxu1 %v710_v3 }
 0x284   :  { %1484 = vmatprep.subr.mxu1 %v1640_v0 }
 0x285   :  { %1485 = vmatpush3.msra.mxu1 %v709_v4  ;;  %v1067_v4 = vld [vmem:[#allocation4 + $0x2a8] sm:$0xff] }
 0x286   :  { %1486 = vmatprep.subr.mxu1 %v1640_v0 }
 0x287   :  { %1487 = vmatpush3.msra.mxu1 %v708_v5 }
 0x288   :  { %1488 = vmatprep.subr.mxu1 %v1640_v0 }
 0x289   :  { %1489 = vmatpush3.msra.mxu1 %v707_v6  ;;  %v1066_v6 = vld [vmem:[#allocation4 + $0x2a0] sm:$0xff] }
 0x28a   :  { %1490 = vmatprep.subr.mxu1 %v1640_v0 }
 0x28b   :  { %1491 = vmatpush3.msra.mxu1 %v706_v7  ;;  %v1065_v7 = vld [vmem:[#allocation4 + $0x298] sm:$0xff] }
 0x28c   :  { %1492 = vmatprep.subr.mxu1 %v1640_v0 }
 0x28d   :  { %1493 = vmatpush3.msra.mxu1 %v705_v8  ;;  %v1064_v8 = vld [vmem:[#allocation4 + $0x290] sm:$0xff] }
 0x28e   :  { %1494 = vmatprep.subr.mxu1 %v1640_v0 }
 0x28f   :  { %1495 = vmatpush3.msra.mxu1 %v704_v9  ;;  %v1063_v9 = vld [vmem:[#allocation4 + $0x288] sm:$0xff] }
 0x290   :  { %1496 = vmatprep.subr.mxu1 %v1640_v0 }
 0x291   :  { %1497 = vmatpush3.msra.mxu1 %v703_v10  ;;  %v1062_v10 = vld [vmem:[#allocation4 + $0x280] sm:$0xff] }
 0x292   :  { %1498 = vmatprep.subr.mxu1 %v1640_v0 }
 0x293   :  { %1499 = vmatpush3.msra.mxu1 %v702_v11  ;;  %v1061_v11 = vld [vmem:[#allocation4 + $0x278] sm:$0xff] }
 0x294   :  { %1508 = vmatprep.subr.mxu1 %v1640_v0 }
 0x2f2   :  { %v1035_v35 = vpop.permute.xlu0 %1034 }
 0x2f7   :  { %v1047_v41 = vpop.permute.xlu0 %1046 }
 0x32d   :  { %v874_v15 = vpop.f32.mrf.mxu0 }
 0x32f   :  { %v1467_v16 = vpop.f32.mrf.mxu0 }
 0x334   :  { %v804_v18 = vpop.f32.mrf.mxu1 }
 0x335   :  { %1501 = vmatmul.mubr.f32.vlgmr.msra.gmra.mxu1 %v804_v18 }
 0x336   :  { %v1432_v20 = vpop.f32.mrf.mxu1  ;;  %1509 = vmatpush3.msra.mxu1 %v1090_v17  ;;  %1540 = vmatprep.mubr.msk.f32.mxu1 %vm1641_vm0, %v1640_v0 }
 0x337   :  { %1510 = vmatprep.subr.mxu1 %v1640_v0 }
 0x338   :  { %1511 = vmatpush3.msra.mxu1 %v1089_v19  ;;  %v1280_v19 = vld [vmem:[#allocation4 + $0x368] ss:$0 sm:$0xff] }
 0x339   :  { %1512 = vmatprep.subr.mxu1 %v1640_v0 }
 0x33a   :  { %1513 = vmatpush3.msra.mxu1 %v1088_v21 }
 0x33b   :  { %1514 = vmatprep.subr.mxu1 %v1640_v0 }
 0x33c   :  { %1515 = vmatpush3.msra.mxu1 %v1087_v22 }
 0x33d   :  { %1516 = vmatprep.subr.mxu1 %v1640_v0 }
 0x33e   :  { %1517 = vmatpush3.msra.mxu1 %v1086_v23 }
 0x33f   :  { %1518 = vmatprep.subr.mxu1 %v1640_v0 }
 0x340   :  { %1519 = vmatpush3.msra.mxu1 %v1085_v24 }
 0x341   :  { %1520 = vmatprep.subr.mxu1 %v1640_v0 }
 0x342   :  { %1521 = vmatpush3.msra.mxu1 %v1084_v25 }
 0x343   :  { %1522 = vmatprep.subr.mxu1 %v1640_v0 }
 0x344   :  { %1523 = vmatpush3.msra.mxu1 %v1083_v26 }
 0x345   :  { %1524 = vmatprep.subr.mxu1 %v1640_v0 }
 0x346   :  { %1525 = vmatpush3.msra.mxu1 %v1082_v27 }
 0x347   :  { %1526 = vmatprep.subr.mxu1 %v1640_v0 }
 0x348   :  { %1527 = vmatpush3.msra.mxu1 %v1081_v28 }
 0x349   :  { %1528 = vmatprep.subr.mxu1 %v1640_v0 }
 0x34a   :  { %1529 = vmatpush3.msra.mxu1 %v1080_v29 }
 0x34b   :  { %1530 = vmatprep.subr.mxu1 %v1640_v0 }
 0x34c   :  { %1531 = vmatpush3.msra.mxu1 %v1079_v30 }
 0x34d   :  { %1532 = vmatprep.subr.mxu1 %v1640_v0 }
 0x34e   :  { %1533 = vmatpush3.msra.mxu1 %v1078_v31 }
 0x34f   :  { %1534 = vmatprep.subr.mxu1 %v1640_v0 }
 0x350   :  { %1535 = vmatpush3.msra.mxu1 %v1077_v32 }
 0x351   :  { %1536 = vmatprep.subr.mxu1 %v1640_v0 }
 0x352   :  { %1537 = vmatpush3.msra.mxu1 %v1076_v33 }
 0x353   :  { %1538 = vmatprep.subr.mxu1 %v1640_v0 }
 0x354   :  { %1539 = vmatpush3.msra.mxu1 %v1075_v34 }
 0x3f5   :  { %v944_v37 = vpop.f32.mrf.mxu1 }
 0x3f6   :  { %v945_v38 = vadd.f32 %v944_v37, %v874_v15 }
 0x3f7   :  { %v1502_v39 = vpop.f32.mrf.mxu1 }
 0x3f8   :  { %v952_v40 = vadd.f32 %v1277_v36, %v945_v38 }
 0x3fa   :  { %v953_v42 = vmax.f32 %v952_v40, 0.0 }
 0x3fc   :  { %1250 = vst [vmem:[%s1794_s2 + $0x2] sm:$0x3f] %v953_v42  ;;  %v1037_v45 = vmul.f32 %v1035_v35, %v953_v42  ;;  %v1049_v46 = vmul.f32 %v1047_v41, %v953_v42  ;;  %1504 = vmatpush3.msk.msra.mxu0 %vm135_vm3, %v953_v42 }
 0x3fd   :  { %1506 = vmatmul.mubr.msk.f32.vlgmr.msra.gmra.mxu0 %vm131_vm4, %v954_v43  ;;  %1543 = vmatprep.subr.mxu0 %v1640_v0 }
 0x3fe   :  { %v1038_v48 = vsel %vm135_vm3, %v1037_v45, -inf  ;;  %v1050_v49 = vsel %vm135_vm3, %v1049_v46, -inf  ;;  %1544 = vmatpush3.msra.mxu0 %v1074_v44  ;;  %1575 = vmatprep.mubr.msk.f32.mxu0 %vm1641_vm0, %v1640_v0 }
 0x3ff   :  { %v1039_v50 = vrot.slane %v1038_v48, 4  ;;  %v1051_v51 = vrot.slane %v1050_v49, 4  ;;  %1545 = vmatprep.subr.mxu0 %v1640_v0 }
 0x400   :  { %1546 = vmatpush3.msra.mxu0 %v1073_v47 }
 0x401   :  { %v1040_v53 = vmax.f32 %v1038_v48, %v1039_v50  ;;  %v1052_v54 = vmax.f32 %v1050_v49, %v1051_v51  ;;  %1547 = vmatprep.subr.mxu0 %v1640_v0 }
 0x402   :  { %1548 = vmatpush3.msra.mxu0 %v1072_v52 }
 0x403   :  { %v1041_v56 = vrot.slane %v1040_v53, 2  ;;  %v1053_v57 = vrot.slane %v1052_v54, 2  ;;  %1549 = vmatprep.subr.mxu0 %v1640_v0 }
 0x404   :  { %1550 = vmatpush3.msra.mxu0 %v1071_v55 }
 0x405   :  { %v1042_v59 = vmax.f32 %v1040_v53, %v1041_v56  ;;  %v1054_v60 = vmax.f32 %v1052_v54, %v1053_v57  ;;  %1551 = vmatprep.subr.mxu0 %v1640_v0 }
 0x406   :  { %1552 = vmatpush3.msra.mxu0 %v1070_v58 }
 0x407   :  { %v1043_v62 = vrot.slane %v1042_v59, 1  ;;  %v1055_v63 = vrot.slane %v1054_v60, 1  ;;  %1553 = vmatprep.subr.mxu0 %v1640_v0 }
 0x408   :  { %1554 = vmatpush3.msra.mxu0 %v1069_v61 }
 0x409   :  { %v1044_v2 = vmax.f32 %v1042_v59, %v1043_v62  ;;  %v1056_v3 = vmax.f32 %v1054_v60, %v1055_v63  ;;  %1555 = vmatprep.subr.mxu0 %v1640_v0 }
 0x40a   :  { %1556 = vmatpush3.msra.mxu0 %v1068_v1 }
 0x40b   :  { %v1058_v5 = vsel %vm1057_vm7, %v1044_v2, %v1056_v3  ;;  %1557 = vmatprep.subr.mxu0 %v1640_v0 }
 0x40c   :  { %1541 = vmatmul.mubr.f32.vlgmr.msra.gmra.mxu1 %v1058_v5  ;;  %1558 = vmatpush3.msra.mxu0 %v1067_v4 }
 0x40d   :  { %1559 = vmatprep.subr.mxu0 %v1640_v0 }
 0x40e   :  { %1560 = vmatpush3.msra.mxu0 %v1066_v6 }
 0x40f   :  { %1561 = vmatprep.subr.mxu0 %v1640_v0 }
 0x410   :  { %1562 = vmatpush3.msra.mxu0 %v1065_v7 }
 0x411   :  { %1563 = vmatprep.subr.mxu0 %v1640_v0 }
 0x412   :  { %1564 = vmatpush3.msra.mxu0 %v1064_v8 }
 0x413   :  { %1565 = vmatprep.subr.mxu0 %v1640_v0 }
 0x414   :  { %1566 = vmatpush3.msra.mxu0 %v1063_v9 }
 0x415   :  { %1567 = vmatprep.subr.mxu0 %v1640_v0 }
 0x416   :  { %1568 = vmatpush3.msra.mxu0 %v1062_v10 }
 0x417   :  { %1569 = vmatprep.subr.mxu0 %v1640_v0 }
 0x418   :  { %1570 = vmatpush3.msra.mxu0 %v1061_v11 }
 0x419   :  { %1571 = vmatprep.subr.mxu0 %v1640_v0 }
 0x41a   :  { %1572 = vmatpush3.msra.mxu0 %v1060_v12 }
 0x41b   :  { %1573 = vmatprep.subr.mxu0 %v1640_v0 }
 0x41c   :  { %1574 = vmatpush3.msra.mxu0 %v1059_v13 }
 0x4bd   :  { %v1028_v14 = vpop.f32.mrf.mxu0 }
 0x4be   :  { %1576 = vmatmul.mubr.f32.vlgmr.msra.gmra.mxu0 %v1028_v14 }
 0x4bf   :  { %v1507_v15 = vpop.f32.mrf.mxu0 }
 0x4cc   :  { %v1157_v16 = vpop.f32.mrf.mxu1 }
 0x4ce   :  { %v1542_v17 = vpop.f32.mrf.mxu1 }
 0x57e   :  { %v1227_v18 = vpop.f32.mrf.mxu0 }
 0x57f   :  { %v1228_v20 = vadd.f32 %v1227_v18, %v1157_v16 }
 0x580   :  { %v1577_v21 = vpop.f32.mrf.mxu0 }
 0x581   :  { %v1236_v22 = vadd.f32 %v1280_v19, %v1228_v20 }
 0x583   :  { %v1238_v23 = vsel %vm1237_vm8, %v1236_v22, -inf }
 0x584   :  { %1239 = vmax.xlane.f32.xlu1 %v1238_v23 }
 0x60d   :  { %v1240_v24 = vpop.xlane.xlu1 %1239 }
 0x60e   :  { %v1241_v25 = vsub.f32 %v1236_v22, %v1240_v24 }
 0x610   :  { %v1242_v26 = vmul.f32 1.442695, %v1241_v25 }
 0x612   :  { %1588 = vpow2.f32 %v1242_v26 }
 0x61f   :  { %v1589_v0 = vpop.eup %1588 }
 0x620   :  { %v1244_v27 = vsel %vm1237_vm8, %v1589_v0, 0.0 }
 0x621   :  { %1245 = vadd.xlane.f32.xlu1 %v1244_v27 }
 0x6aa   :  { %v1246_v28 = vpop.xlane.xlu1 %1245 }
 0x6ab   :  { %1590 = vrcp.f32 %v1246_v28 }
 0x6b8   :  { %v1591_v29 = vpop.eup %1590 }
 0x6b9   :  { %v1248_v30 = vmul.f32 %v1591_v29, %v1589_v0 }
 0x6bb   :  { %1249 = vst [vmem:[%s1794_s2] sm:$0x3] %v1248_v30 }
 0x6bc   :  { %1255 = vsyncpa [#allocation3], 1 }
 0x6bd   :  { %1256 = vsyncpa [#allocation5], 1 }

</bundles_post_ra>
